<compile_context>
chip_gen: v7x
topology: tpu7x:2x2x1
jax: 0.10.0
libtpu: 0.0.40
codegen_flags: <defaults>
</compile_context>

<pallas_src>
import math

import numpy as np
import jax
import jax.numpy as jnp
from jax.experimental import pallas as pl
from jax.experimental.pallas import tpu as pltpu


# ----------------------------------------------------------------------------
# pe buffer (module __init__ glue, plain JAX)
# ----------------------------------------------------------------------------
def make_sinusoidal_pe(num_tokens: int, embedding_dim: int) -> jnp.ndarray:
    """Reproduces the torch buffer `pe` of shape (1, num_tokens, embedding_dim)."""
    assert embedding_dim % 2 == 0, "embedding_dim must be even (matches torch interleave)"
    position = jnp.arange(num_tokens, dtype=jnp.float32)[:, None]          # (T, 1)
    div_term = jnp.exp(
        jnp.arange(0, embedding_dim, 2, dtype=jnp.float32)
        * (-math.log(10000.0) / embedding_dim)
    )                                                                       # (D/2,)
    sin = jnp.sin(position * div_term)                                      # (T, D/2)
    cos = jnp.cos(position * div_term)                                      # (T, D/2)
    # interleave: pe[:, 0::2] = sin, pe[:, 1::2] = cos
    pe = jnp.stack([sin, cos], axis=-1).reshape(num_tokens, embedding_dim)
    return pe[None, :, :]                                                   # (1, T, D)


# ----------------------------------------------------------------------------
# Pallas kernels
# ----------------------------------------------------------------------------
def _pe_add_eval_kernel(x_ref, pe_ref, o_ref):
    # eval mode: dropout is identity; pe block (1, tT, D) broadcasts over batch
    o_ref[...] = (x_ref[...] + pe_ref[...]).astype(o_ref.dtype)


def _make_pe_add_dropout_kernel(p: float, bB: int, tT: int):
    inv_keep = float(1.0 / (1.0 - p))
    # keep element iff hashed u32 >= p * 2^32  (numpy scalar -> jaxpr literal)
    threshold = np.uint32(min(int(round(p * (2.0 ** 32))), 2 ** 32 - 1))

    def kernel(seed_ref, x_ref, pe_ref, o_ref):
        t = pl.program_id(0)
        b = pl.program_id(1)
        y = x_ref[...] + pe_ref[...]                          # (bB, tT, D), x.dtype

        # --- stateless counter-based PRNG over absolute element coordinates ---
        shape = y.shape
        bi = jax.lax.broadcasted_iota(jnp.uint32, shape, 0) + (b * bB).astype(jnp.uint32)
        ti = jax.lax.broadcasted_iota(jnp.uint32, shape, 1) + (t * tT).astype(jnp.uint32)
        ci = jax.lax.broadcasted_iota(jnp.uint32, shape, 2)
        seed = seed_ref[0].astype(jnp.uint32)

        key = (bi * np.uint32(0x85EBCA77)
               ^ ti * np.uint32(0xC2B2AE3D)
               ^ ci * np.uint32(0x27D4EB2F)
               ^ seed * np.uint32(0x165667B1))
        # murmur3 fmix32 finalizer
        key = key ^ (key >> 16)
        key = key * np.uint32(0x85EBCA6B)
        key = key ^ (key >> 13)
        key = key * np.uint32(0xC2B2AE35)
        key = key ^ (key >> 16)

        keep = key >= threshold
        o_ref[...] = jnp.where(keep, y * inv_keep, 0.0).astype(o_ref.dtype)

    return kernel


# ----------------------------------------------------------------------------
# Tiling helper: pick (bB, tT) purely from a byte budget.
#  * tT is a multiple of 8 (sublane) or the full T axis -> always (8,128)-legal
#    (D is kept full-width, lane-dense stores).
#  * Ragged last blocks are handled via pl.cdiv grids.
# ----------------------------------------------------------------------------
def _choose_tiles(B: int, T: int, D: int, itemsize: int,
                  target_bytes: int = 2 * 1024 * 1024):
    row_bytes = max(1, D * itemsize)
    max_rows = max(1, target_bytes // row_bytes)    # total (batch*token) rows / block
    if T <= max_rows:
        tT = T                                      # full token axis fits
    else:
        tT = min(T, max(8, (max_rows // 8) * 8))    # multiple of 8, or full axis
    bB = max(1, min(B, max_rows // max(tT, 1)))     # fold batch rows into the block
    return bB, tT


# ----------------------------------------------------------------------------
# Wrapper
# ----------------------------------------------------------------------------
def sinusoidal_positional_encoding(
    x: jnp.ndarray,
    pe: jnp.ndarray,
    *,
    dropout_p: float = 0.1,
    training: bool = False,
    seed: int = 0,
) -> jnp.ndarray:
    """x: (B, T, D);  pe: (1, T, D)."""
    B, T, D = x.shape
    assert pe.shape == (1, T, D)

    # Match dtypes outside the kernel: halves pe HBM traffic / VMEM footprint
    # when x is bf16 (free relative to HBM otherwise).
    pe = pe.astype(x.dtype)

    bB, tT = _choose_tiles(B, T, D, jnp.dtype(x.dtype).itemsize)
    grid = (pl.cdiv(T, tT), pl.cdiv(B, bB))   # batch innermost -> pe DMA amortized

    # index_maps accept (*grid_idx, *optional_prefetch_refs)
    x_spec = pl.BlockSpec((bB, tT, D), lambda t, b, *_: (b, t, 0))
    pe_spec = pl.BlockSpec((1, tT, D), lambda t, b, *_: (0, t, 0))
    out_spec = pl.BlockSpec((bB, tT, D), lambda t, b, *_: (b, t, 0))

    compiler_params = pltpu.CompilerParams(
        dimension_semantics=("parallel", "parallel"),
    )

    if training and dropout_p > 0.0:
        seed_arr = jnp.array([seed], dtype=jnp.int32)
        return pl.pallas_call(
            _make_pe_add_dropout_kernel(dropout_p, bB, tT),
            out_shape=jax.ShapeDtypeStruct((B, T, D), x.dtype),
            grid_spec=pltpu.PrefetchScalarGridSpec(
                num_scalar_prefetch=1,          # seed lands in SMEM
                grid=grid,
                in_specs=[x_spec, pe_spec],
                out_specs=out_spec,
            ),
            compiler_params=compiler_params,
        )(seed_arr, x, pe)

    # eval / p == 0: no scalar prefetch, no seed argument on the hot path
    return pl.pallas_call(
        _pe_add_eval_kernel,
        out_shape=jax.ShapeDtypeStruct((B, T, D), x.dtype),
        grid_spec=pl.GridSpec(
            grid=grid,
            in_specs=[x_spec, pe_spec],
            out_specs=out_spec,
        ),
        compiler_params=compiler_params,
    )(x, pe)


# ----------------------------------------------------------------------------
# main
# ----------------------------------------------------------------------------
if __name__ == "__main__":
    # small shapes consistent with the module defaults:
    # (batch, num_tokens=3, embedding_dim=1280)
    B, T, D = 2, 3, 1280
    dropout_p = 0.1

    key = jax.random.PRNGKey(0)
    x = jax.random.normal(key, (B, T, D), dtype=jnp.float32)
    pe = make_sinusoidal_pe(T, D)

    # eval mode (dropout = identity) — deterministic check against pure-JAX ref
    out_eval = sinusoidal_positional_encoding(x, pe, dropout_p=dropout_p, training=False)
    out_eval = jax.block_until_ready(out_eval)
    ref = x + pe
    assert out_eval.shape == (B, T, D)
    assert jnp.allclose(out_eval, ref, atol=1e-6), "eval-mode mismatch"

    # train mode (dropout active, in-kernel counter-hash PRNG)
    out_train = sinusoidal_positional_encoding(
        x, pe, dropout_p=dropout_p, training=True, seed=1234
    )
    out_train = jax.block_until_ready(out_train)
    assert out_train.shape == (B, T, D)
    # surviving elements equal ref / (1 - p); dropped elements are exactly 0
    scaled_ref = ref / (1.0 - dropout_p)
    ok = jnp.logical_or(out_train == 0.0, jnp.abs(out_train - scaled_ref) < 1e-3)
    assert bool(jnp.all(ok)), "train-mode dropout values inconsistent"
    # dropout should drop roughly p of the elements (sanity, generous bounds)
    frac_zero = float(jnp.mean((out_train == 0.0).astype(jnp.float32)))
    assert 0.01 < frac_zero < 0.3, f"dropout fraction looks wrong: {frac_zero}"

    print("KERNEL_OK")
</pallas_src>

<mosaic_0001>
module attributes {stable_mosaic.version = 11 : i64} {
  func.func @_pe_add_eval_kernel(%arg0: i32, %arg1: i32, %arg2: memref<2x3x1280xf32, #tpu.memory_space<vmem>>, %arg3: memref<1x3x1280xf32, #tpu.memory_space<vmem>>, %arg4: memref<2x3x1280xf32, #tpu.memory_space<vmem>>) attributes {dimension_semantics = [#tpu.dimension_semantics<parallel>, #tpu.dimension_semantics<parallel>], iteration_bounds = array<i64: 1, 1>, scalar_prefetch = 0 : i64, scratch_operands = 0 : i64, tpu.core_type = #tpu.core_type<tc>, window_params = [{transform_indices = @transform_0, window_bounds = array<i64: 2, 3, 1280>}, {transform_indices = @transform_1, window_bounds = array<i64: 1, 3, 1280>}, {transform_indices = @transform_2, window_bounds = array<i64: 2, 3, 1280>}]} {
    %c0 = arith.constant 0 : index
    %c0_0 = arith.constant 0 : index
    %c0_1 = arith.constant 0 : index
    %0 = vector.load %arg2[%c0, %c0_0, %c0_1] : memref<2x3x1280xf32, #tpu.memory_space<vmem>>, vector<2x3x1280xf32>
    %c0_2 = arith.constant 0 : index
    %c0_3 = arith.constant 0 : index
    %c0_4 = arith.constant 0 : index
    %1 = vector.load %arg3[%c0_2, %c0_3, %c0_4] : memref<1x3x1280xf32, #tpu.memory_space<vmem>>, vector<1x3x1280xf32>
    %2 = vector.broadcast %1 : vector<1x3x1280xf32> to vector<2x3x1280xf32>
    %3 = arith.addf %0, %2 : vector<2x3x1280xf32>
    %c0_5 = arith.constant 0 : index
    %c0_6 = arith.constant 0 : index
    %c0_7 = arith.constant 0 : index
    %4 = vector.load %arg4[%c0_5, %c0_6, %c0_7] : memref<2x3x1280xf32, #tpu.memory_space<vmem>>, vector<2x3x1280xf32>
    tpu.vector_store %arg4[%c0_5, %c0_6, %c0_7], %3 {strides = array<i32>} : memref<2x3x1280xf32, #tpu.memory_space<vmem>>, vector<2x3x1280xf32>,
    return
  }
  func.func @transform_0(%arg0: i32, %arg1: i32) -> (i32, i32, i32) {
    %c0_i32 = arith.constant 0 : i32
    %c0_i32_0 = arith.constant 0 : i32
    return %arg1, %arg0, %c0_i32 : i32, i32, i32
  }
  func.func @transform_1(%arg0: i32, %arg1: i32) -> (i32, i32, i32) {
    %c0_i32 = arith.constant 0 : i32
    %c0_i32_0 = arith.constant 0 : i32
    %c0_i32_1 = arith.constant 0 : i32
    return %c0_i32, %arg0, %c0_i32_0 : i32, i32, i32
  }
  func.func @transform_2(%arg0: i32, %arg1: i32) -> (i32, i32, i32) {
    %c0_i32 = arith.constant 0 : i32
    %c0_i32_0 = arith.constant 0 : i32
    return %arg1, %arg0, %c0_i32 : i32, i32, i32
  }
}

</mosaic_0001>

<bundles_post_ra>
// kernel: tpu_custom_call.1
= control target key start
LH: loop header
LB: loop body
LE: loop exit
PB: predicated region body
PF: predicated region fallthrough
CT: control target
= control target key end

     0   :  { %s140_s0 = inlined_call_operand.vmem [shape: f32[2,3,1280], index: 0, kind: input, shape index: {}]   ;;  %s141_s1 = inlined_call_operand.vmem [shape: f32[1,3,1280], index: 1, kind: input, shape index: {}]   ;;  %s142_s2 = inlined_call_operand.vmem [shape: f32[2,3,1280], index: 2, kind: output, shape index: {}]  }
   0x1   :  { %v11_v0 = vld [vmem:[%s140_s0] sm:$0x77]  ;;  %v12_v2 = vld [vmem:[%s140_s0 + $0x8] sm:$0x77]  ;;  %v13_v5 = vld [vmem:[%s140_s0 + $0x10] sm:$0x77] }
   0x2   :  { %v21_v1 = vld [vmem:[%s141_s1] sm:$0x77]  ;;  %v22_v4 = vld [vmem:[%s141_s1 + $0x8] sm:$0x77]  ;;  %v23_v6 = vld [vmem:[%s141_s1 + $0x10] sm:$0x77] }
   0x3   :  { %v26_v3 = vadd.f32 %v21_v1, %v11_v0  ;;  %v27_v7 = vadd.f32 %v22_v4, %v12_v2  ;;  %v28_v8 = vadd.f32 %v23_v6, %v13_v5  ;;  %v14_v9 = vld [vmem:[%s140_s0 + $0x18] sm:$0x77]  ;;  %v15_v11 = vld [vmem:[%s140_s0 + $0x20] sm:$0x77]  ;;  %v16_v14 = vld [vmem:[%s140_s0 + $0x28] sm:$0x77] }
   0x4   :  { %v24_v10 = vld [vmem:[%s141_s1 + $0x18] sm:$0x77]  ;;  %v25_v13 = vld [vmem:[%s141_s1 + $0x20] sm:$0x77]  ;;  %v17_v15 = vld [vmem:[%s140_s0 + $0x30] sm:$0x77]  ;;  %v31_v17 = vadd.f32 %v21_v1, %v16_v14 }
   0x5   :  { %36 = vst [vmem:[%s142_s2] sm:$0x77] %v26_v3  ;;  %v29_v12 = vadd.f32 %v24_v10, %v14_v9  ;;  %37 = vst [vmem:[%s142_s2 + $0x8] sm:$0x77] %v27_v7  ;;  %v30_v16 = vadd.f32 %v25_v13, %v15_v11  ;;  %v32_v18 = vadd.f32 %v22_v4, %v17_v15  ;;  %v18_v19 = vld [vmem:[%s140_s0 + $0x38] sm:$0x77] }
   0x6   :  { %38 = vst [vmem:[%s142_s2 + $0x10] sm:$0x77] %v28_v8  ;;  %v19_v20 = vld [vmem:[%s140_s0 + $0x40] sm:$0x77]  ;;  %v20_v21 = vld [vmem:[%s140_s0 + $0x48] sm:$0x77]  ;;  %v33_v22 = vadd.f32 %v23_v6, %v18_v19 }
   0x7   :  { %39 = vst [vmem:[%s142_s2 + $0x18] sm:$0x77] %v29_v12  ;;  %v34_v23 = vadd.f32 %v24_v10, %v19_v20  ;;  %v35_v24 = vadd.f32 %v25_v13, %v20_v21  ;;  %40 = vst [vmem:[%s142_s2 + $0x20] sm:$0x77] %v30_v16 }
   0x8   :  { %41 = vst [vmem:[%s142_s2 + $0x28] sm:$0x77] %v31_v17  ;;  %42 = vst [vmem:[%s142_s2 + $0x30] sm:$0x77] %v32_v18 }
   0x9   :  { %43 = vst [vmem:[%s142_s2 + $0x38] sm:$0x77] %v33_v22  ;;  %44 = vst [vmem:[%s142_s2 + $0x40] sm:$0x77] %v34_v23 }
   0xa   :  { %45 = vst [vmem:[%s142_s2 + $0x48] sm:$0x77] %v35_v24 }

</bundles_post_ra>
